<compile_context>
chip_gen: v7x
topology: tpu7x:2x2x1
jax: 0.10.0
libtpu: 0.0.40
codegen_flags: <defaults>
</compile_context>

<pallas_src>
import functools

import jax
import jax.numpy as jnp
from jax.experimental import pallas as pl
from jax.experimental.pallas import tpu as pltpu


def _round_up(x, m):
    return ((x + m - 1) // m) * m


def _vmem_capacity_bytes():
    """Physical per-core VMEM; falls back to the conservative v7x 64 MiB."""
    try:
        return int(pltpu.get_tpu_info().vmem_capacity_bytes)
    except Exception:  # hardware query only; fall back safely, never on the hot path
        return 64 << 20


def adapter_kernel(x_ref, wd_ref, bd_ref, wu_ref, bu_ref, o_ref, *, activation):
    """One row-tile of: y = x + up_project(act(down_project(x))).

    x_ref : [tm, H]    input tile (streamed)
    wd_ref: [H,  Ap]   down-projection weight (resident)
    bd_ref: [1,  Ap]   down-projection bias
    wu_ref: [Ap, H]    up-projection weight (resident)
    bu_ref: [1,  H]    up-projection bias
    o_ref : [tm, H]    output tile
    """
    x = x_ref[...]
    # Down projection: f32 MXU accumulation + bias.
    h = jnp.dot(x, wd_ref[...], preferred_element_type=jnp.float32) + bd_ref[...]
    if activation == "gelu":
        # Exact (erf) GELU to match nn.GELU(); EUP handles the transcendental.
        h = jax.nn.gelu(h, approximate=False)
    else:
        h = jnp.maximum(h, 0.0)
    # Cast the bottleneck back to the input dtype so the up-projection runs the
    # fast (bf16-capable) MXU path; accumulation stays f32.
    h = h.astype(x.dtype)
    up = jnp.dot(h, wu_ref[...], preferred_element_type=jnp.float32) + bu_ref[...]
    # Residual add in the input dtype: no [tm, H] f32 temporary for x.
    o_ref[...] = x + up.astype(x.dtype)


def pad_adapter_params(w_down, b_down, w_up, b_up):
    """Zero-pad the adapter (bottleneck) dim to a 128-lane multiple and reshape
    biases to rows. Call once at parameter-creation time (hoisted out of the
    per-forward hot path)."""
    H, A = w_down.shape
    Ap = max(128, _round_up(A, 128))
    if Ap == A:
        wd = w_down
        bd = b_down.reshape(1, Ap)
        wu = w_up
    else:
        wd = jnp.zeros((H, Ap), w_down.dtype).at[:, :A].set(w_down)
        bd = jnp.zeros((1, Ap), b_down.dtype).at[0, :A].set(b_down.reshape(-1))
        wu = jnp.zeros((Ap, H), w_up.dtype).at[:A, :].set(w_up)
    bu = b_up.reshape(1, H)
    return wd, bd, wu, bu


def _choose_row_tile(m_rows, hidden, adapter_p, itemsize, vmem_cap):
    """Largest row tile that, together with the resident weights and in-kernel
    temporaries, fits comfortably in this generation's VMEM."""
    sub = 8 if itemsize >= 4 else 16                       # sublane multiple
    weight_bytes = (2 * hidden * adapter_p + hidden + adapter_p) * itemsize
    usable = max(vmem_cap - vmem_cap // 8, 32 << 20)       # leave compiler scratch
    budget = max(int(usable * 0.8) - weight_bytes, 2 << 20)
    # Per-row bytes: double-buffered x + out tiles and a residual-add temporary
    # (input dtype), plus the f32 bottleneck h and its input-dtype copy.
    per_row = 5 * hidden * itemsize + adapter_p * (4 + itemsize)
    tm = max(sub, (budget // per_row) // sub * sub)
    tm = min(1024, tm, _round_up(m_rows, sub))
    # v7x: an odd step count leaves one of the two TensorCores with extra tiles;
    # shave the tile so the ("parallel",) grid splits evenly. Harmless on 1-TC parts.
    steps = pl.cdiv(m_rows, tm)
    if steps > 1 and steps % 2 == 1:
        tm_even = _round_up(pl.cdiv(m_rows, steps + 1), sub)
        if tm_even >= sub and pl.cdiv(m_rows, tm_even) % 2 == 0:
            tm = tm_even
    return int(tm)


def adapter_forward(x, wd, bd, wu, bu, *, activation="relu", tm=None):
    """Apply the adapter. x: [..., H]; params come from pad_adapter_params.
    Returns the same shape/dtype as x."""
    orig_shape = x.shape
    H = orig_shape[-1]
    Ap = wd.shape[1]
    x2 = x.reshape(-1, H)
    M = x2.shape[0]
    itemsize = jnp.dtype(x.dtype).itemsize
    sub = 8 if itemsize >= 4 else 16

    vmem_cap = _vmem_capacity_bytes()
    if tm is None:
        tm = _choose_row_tile(M, H, Ap, itemsize, vmem_cap)
    tm = max(sub, (int(tm) // sub) * sub)

    steps = pl.cdiv(M, tm)           # ragged last block handled by Pallas masking
    grid = (steps,)

    weight_bytes = (2 * H * Ap + H + Ap) * jnp.dtype(wd.dtype).itemsize
    # x/out double buffers + residual temp + f32 bottleneck + its cast copy +
    # single-buffered weights; ~20% headroom before clamping to the physical cap.
    needed = (4 * tm * H * itemsize
              + tm * H * itemsize
              + tm * Ap * (4 + itemsize)
              + weight_bytes)
    vmem_limit = int(min(max(int(needed * 1.2) + (1 << 20), 32 << 20), vmem_cap))

    cost = pl.CostEstimate(
        flops=4 * M * H * Ap,
        transcendentals=0,
        bytes_accessed=2 * M * H * itemsize + weight_bytes,
    )

    def _resident(shape):
        # Constant index_map -> fetched once; one buffer is enough.
        return pl.BlockSpec(shape, lambda i: (0, 0), pipeline_mode=pl.Buffered(1))

    if steps == 1:
        # Single grid step: double-buffering the streamed input is pure VMEM waste.
        x_spec = pl.BlockSpec((tm, H), lambda i: (i, 0), pipeline_mode=pl.Buffered(1))
    else:
        x_spec = pl.BlockSpec((tm, H), lambda i: (i, 0))

    out = pl.pallas_call(
        functools.partial(adapter_kernel, activation=activation),
        out_shape=jax.ShapeDtypeStruct((M, H), x.dtype),
        grid_spec=pltpu.PrefetchScalarGridSpec(
            num_scalar_prefetch=0,
            grid=grid,
            in_specs=[
                x_spec,               # x row tile (streamed)
                _resident((H, Ap)),   # W_down (resident)
                _resident((1, Ap)),   # b_down
                _resident((Ap, H)),   # W_up   (resident)
                _resident((1, H)),    # b_up
            ],
            out_specs=pl.BlockSpec((tm, H), lambda i: (i, 0)),
        ),
        compiler_params=pltpu.CompilerParams(
            dimension_semantics=("parallel",),
            vmem_limit_bytes=vmem_limit),
        cost_estimate=cost,
    )(x2, wd, bd, wu, bu)

    return out.reshape(orig_shape)


def init_adapter_params(key, hidden_size, adapter_size, dtype=jnp.float32):
    """Matches the PyTorch module init: normal(std=0.001) weights, zero biases."""
    k1, k2 = jax.random.split(key)
    # nn.Linear weight is [out, in]; we store the transpose for x @ W.
    w_down = (0.001 * jax.random.normal(k1, (adapter_size, hidden_size))).T.astype(dtype)
    b_down = jnp.zeros((adapter_size,), dtype)
    w_up = (0.001 * jax.random.normal(k2, (hidden_size, adapter_size))).T.astype(dtype)
    b_up = jnp.zeros((hidden_size,), dtype)
    return w_down, b_down, w_up, b_up


def _reference(x, w_down, b_down, w_up, b_up):
    h = jnp.maximum(x @ w_down + b_down, 0.0)
    return x + (h @ w_up + b_up)


if __name__ == "__main__":
    batch, seq, hidden, adapter = 2, 8, 32, 64
    key = jax.random.PRNGKey(0)
    kx, kp, kx2, kx3 = jax.random.split(key, 4)

    w_down, b_down, w_up, b_up = init_adapter_params(kp, hidden, adapter)
    # Pad / reshape the params once (hoisted out of the forward hot path).
    params = pad_adapter_params(w_down, b_down, w_up, b_up)

    # Case 1: standard small shape.
    x = jax.random.normal(kx, (batch, seq, hidden), dtype=jnp.float32)
    y = jax.block_until_ready(adapter_forward(x, *params))
    y_ref = _reference(x, w_down, b_down, w_up, b_up)
    assert y.shape == x.shape and y.dtype == x.dtype
    assert jnp.allclose(y, y_ref, atol=1e-5), "mismatch vs reference (case 1)"

    # Case 2: row count not divisible by the tile -> ragged last block handled by
    # Pallas masking (no wrapper-side pad / slice copies of x).
    x2 = jax.random.normal(kx2, (3, 5, hidden), dtype=jnp.float32)
    y2 = jax.block_until_ready(adapter_forward(x2, *params, tm=8))
    y2_ref = _reference(x2, w_down, b_down, w_up, b_up)
    assert y2.shape == x2.shape
    assert jnp.allclose(y2, y2_ref, atol=1e-5), "mismatch vs reference (case 2)"

    # Case 3: bf16 tolerance test (bottleneck + residual run in bf16 on MXU/VPU).
    bf16_params = pad_adapter_params(w_down.astype(jnp.bfloat16),
                                     b_down.astype(jnp.bfloat16),
                                     w_up.astype(jnp.bfloat16),
                                     b_up.astype(jnp.bfloat16))
    xb = jax.random.normal(kx3, (4, seq, hidden), dtype=jnp.bfloat16)
    yb = jax.block_until_ready(adapter_forward(xb, *bf16_params))
    yb_ref = _reference(xb.astype(jnp.float32), w_down, b_down, w_up, b_up)
    assert yb.shape == xb.shape and yb.dtype == xb.dtype
    assert jnp.allclose(yb.astype(jnp.float32), yb_ref, atol=5e-2, rtol=5e-2), \
        "mismatch vs reference (case 3, bf16)"

    print("KERNEL_OK")
</pallas_src>

<mosaic_0001>
module attributes {stable_mosaic.version = 11 : i64} {
  func.func @adapter_kernel(%arg0: i32, %arg1: memref<16x32xf32, #tpu.memory_space<vmem>>, %arg2: memref<32x128xf32, #tpu.memory_space<vmem>>, %arg3: memref<1x128xf32, #tpu.memory_space<vmem>>, %arg4: memref<128x32xf32, #tpu.memory_space<vmem>>, %arg5: memref<1x32xf32, #tpu.memory_space<vmem>>, %arg6: memref<16x32xf32, #tpu.memory_space<vmem>>) attributes {dimension_semantics = [#tpu.dimension_semantics<parallel>], iteration_bounds = array<i64: 1>, scalar_prefetch = 0 : i64, scratch_operands = 0 : i64, tpu.core_type = #tpu.core_type<tc>, window_params = [{pipeline_mode = #tpu.pipeline_mode<synchronous>, transform_indices = @transform_0, window_bounds = array<i64: 16, 32>}, {pipeline_mode = #tpu.pipeline_mode<synchronous>, transform_indices = @transform_1, window_bounds = array<i64: 32, 128>}, {pipeline_mode = #tpu.pipeline_mode<synchronous>, transform_indices = @transform_2, window_bounds = array<i64: 1, 128>}, {pipeline_mode = #tpu.pipeline_mode<synchronous>, transform_indices = @transform_3, window_bounds = array<i64: 128, 32>}, {pipeline_mode = #tpu.pipeline_mode<synchronous>, transform_indices = @transform_4, window_bounds = array<i64: 1, 32>}, {transform_indices = @transform_5, window_bounds = array<i64: 16, 32>}]} {
    %c0 = arith.constant 0 : index
    %c0_0 = arith.constant 0 : index
    %0 = vector.load %arg1[%c0, %c0_0] : memref<16x32xf32, #tpu.memory_space<vmem>>, vector<16x32xf32>
    %c0_1 = arith.constant 0 : index
    %c0_2 = arith.constant 0 : index
    %1 = vector.load %arg2[%c0_1, %c0_2] : memref<32x128xf32, #tpu.memory_space<vmem>>, vector<32x128xf32>
    %cst = arith.constant dense<0.000000e+00> : vector<16x128xf32>
    %2 = tpu.matmul %0, %1, %cst {dimension_numbers = #tpu.dot_dimension_numbers<[1], [0], [0], [1], [0, 0, 1, 1], [], []>} : vector<16x32xf32>, vector<32x128xf32>, vector<16x128xf32> -> vector<16x128xf32>
    %c0_3 = arith.constant 0 : index
    %c0_4 = arith.constant 0 : index
    %3 = vector.load %arg3[%c0_3, %c0_4] : memref<1x128xf32, #tpu.memory_space<vmem>>, vector<1x128xf32>
    %4 = vector.broadcast %3 : vector<1x128xf32> to vector<16x128xf32>
    %5 = arith.addf %2, %4 : vector<16x128xf32>
    %cst_5 = arith.constant 0.000000e+00 : f32
    %6 = vector.broadcast %cst_5 : f32 to vector<16x128xf32>
    %7 = arith.maximumf %5, %6 : vector<16x128xf32>
    %c0_6 = arith.constant 0 : index
    %c0_7 = arith.constant 0 : index
    %8 = vector.load %arg4[%c0_6, %c0_7] : memref<128x32xf32, #tpu.memory_space<vmem>>, vector<128x32xf32>
    %cst_8 = arith.constant dense<0.000000e+00> : vector<16x32xf32>
    %9 = tpu.matmul %7, %8, %cst_8 {dimension_numbers = #tpu.dot_dimension_numbers<[1], [0], [0], [1], [0, 0, 1, 1], [], []>} : vector<16x128xf32>, vector<128x32xf32>, vector<16x32xf32> -> vector<16x32xf32>
    %c0_9 = arith.constant 0 : index
    %c0_10 = arith.constant 0 : index
    %10 = vector.load %arg5[%c0_9, %c0_10] : memref<1x32xf32, #tpu.memory_space<vmem>>, vector<1x32xf32>
    %11 = vector.broadcast %10 : vector<1x32xf32> to vector<16x32xf32>
    %12 = arith.addf %9, %11 : vector<16x32xf32>
    %13 = arith.addf %0, %12 : vector<16x32xf32>
    %c0_11 = arith.constant 0 : index
    %c0_12 = arith.constant 0 : index
    %14 = vector.load %arg6[%c0_11, %c0_12] : memref<16x32xf32, #tpu.memory_space<vmem>>, vector<16x32xf32>
    tpu.vector_store %arg6[%c0_11, %c0_12], %13 {strides = array<i32>} : memref<16x32xf32, #tpu.memory_space<vmem>>, vector<16x32xf32>,
    return
  }
  func.func @transform_0(%arg0: i32) -> (i32, i32) {
    %c0_i32 = arith.constant 0 : i32
    %c0_i32_0 = arith.constant 0 : i32
    return %arg0, %c0_i32 : i32, i32
  }
  func.func @transform_1(%arg0: i32) -> (i32, i32) {
    %c0_i32 = arith.constant 0 : i32
    %c0_i32_0 = arith.constant 0 : i32
    %c0_i32_1 = arith.constant 0 : i32
    return %c0_i32, %c0_i32_0 : i32, i32
  }
  func.func @transform_2(%arg0: i32) -> (i32, i32) {
    %c0_i32 = arith.constant 0 : i32
    %c0_i32_0 = arith.constant 0 : i32
    %c0_i32_1 = arith.constant 0 : i32
    return %c0_i32, %c0_i32_0 : i32, i32
  }
  func.func @transform_3(%arg0: i32) -> (i32, i32) {
    %c0_i32 = arith.constant 0 : i32
    %c0_i32_0 = arith.constant 0 : i32
    %c0_i32_1 = arith.constant 0 : i32
    return %c0_i32, %c0_i32_0 : i32, i32
  }
  func.func @transform_4(%arg0: i32) -> (i32, i32) {
    %c0_i32 = arith.constant 0 : i32
    %c0_i32_0 = arith.constant 0 : i32
    %c0_i32_1 = arith.constant 0 : i32
    return %c0_i32, %c0_i32_0 : i32, i32
  }
  func.func @transform_5(%arg0: i32) -> (i32, i32) {
    %c0_i32 = arith.constant 0 : i32
    %c0_i32_0 = arith.constant 0 : i32
    return %arg0, %c0_i32 : i32, i32
  }
}

</mosaic_0001>

<bundles_post_ra>
// kernel: tpu_custom_call.1
= control target key start
LH: loop header
LB: loop body
LE: loop exit
PB: predicated region body
PF: predicated region fallthrough
CT: control target
= control target key end

     0   :  { %vm34_vm0 = vcmask 261120   ;;  %s502_s0 = inlined_call_operand.vmem [shape: f32[16,32], index: 0, kind: input, shape index: {}]   ;;  %s503_s1 = inlined_call_operand.vmem [shape: f32[32,128], index: 1, kind: input, shape index: {}]   ;;  %s504_s2 = inlined_call_operand.vmem [shape: f32[1,128], index: 2, kind: input, shape index: {}]   ;;  %s505_s3 = inlined_call_operand.vmem [shape: f32[128,32], index: 3, kind: input, shape index: {}]   ;;  %s506_s4 = inlined_call_operand.vmem [shape: f32[1,32], index: 4, kind: input, shape index: {}]   ;;  %s507_s5 = inlined_call_operand.hbm [shape: f32[16,32], index: 5, kind: output, shape index: {}]  }
   0x1   :  { %v23_v0 = vld [vmem:[%s503_s1] sm:$0xff]  ;;  %v24_v1 = vld [vmem:[%s503_s1 + $0x8] sm:$0xff]  ;;  %v25_v2 = vld [vmem:[%s503_s1 + $0x10] sm:$0xff] }
   0x2   :  { %v310_v3 = vpack.c.bf16 %v24_v1, %v23_v0  ;;  %v26_v4 = vld [vmem:[%s503_s1 + $0x18] sm:$0xff]  ;;  %v425_v5 = vld [vmem:[%s502_s0] sm:$0xff]  ;;  %v119_v8 = vld [vmem:[%s505_s3 + $0x8] sm:$0xff] }
   0x3   :  { %v314_v6 = vpack.c.bf16 %v26_v4, %v25_v2  ;;  %272 = vmatprep.mubr.msk.f32.mxu0 %vm34_vm0, %v425_v5  ;;  %v118_v7 = vld [vmem:[%s505_s3] sm:$0xff]  ;;  %v120_v9 = vld [vmem:[%s505_s3 + $0x10] sm:$0xff]  ;;  %v121_v11 = vld [vmem:[%s505_s3 + $0x18] sm:$0xff] }
   0x4   :  { %311 = vmatprep.subr.bf16.mxu0 %v310_v3  ;;  %v318_v10 = vpack.c.bf16 %v119_v8, %v118_v7  ;;  %v322_v12 = vpack.c.bf16 %v121_v11, %v120_v9  ;;  %v122_v13 = vld [vmem:[%s505_s3 + $0x20] sm:$0xff]  ;;  %v123_v14 = vld [vmem:[%s505_s3 + $0x28] sm:$0xff] }
   0x5   :  { %313 = vmatpush3.bf16.msra.mxu0 %v310_v3 }
   0x6   :  { %315 = vmatprep.subr.bf16.mxu0 %v314_v6  ;;  %319 = vmatprep.subr.bf16.mxu1 %v318_v10 }
   0x7   :  { %321 = vmatpush3.bf16.msra.mxu1 %v318_v10 }
   0x8   :  { %10 = vsyncpa [#allocation3], 0  ;;  %323 = vmatprep.subr.bf16.mxu1 %v322_v12  ;;  %v326_v15 = vpack.c.bf16 %v123_v14, %v122_v13  ;;  %v22_v16 = vld [vmem:[%s502_s0 + $0x8] sm:$0xff]  ;;  %v124_v17 = vld [vmem:[%s505_s3 + $0x30] sm:$0xff] }
   0x9   :  { %317 = vmatpush3.bf16.msra.mxu0 %v314_v6  ;;  %v125_v18 = vld [vmem:[%s505_s3 + $0x38] sm:$0xff]  ;;  %v126_v20 = vld [vmem:[%s505_s3 + $0x40] sm:$0xff]  ;;  %v127_v21 = vld [vmem:[%s505_s3 + $0x48] sm:$0xff] }
   0xa   :  { %v330_v19 = vpack.c.bf16 %v125_v18, %v124_v17  ;;  %v334_v22 = vpack.c.bf16 %v127_v21, %v126_v20  ;;  %v128_v23 = vld [vmem:[%s505_s3 + $0x50] sm:$0xff]  ;;  %v129_v24 = vld [vmem:[%s505_s3 + $0x58] sm:$0xff]  ;;  %v130_v26 = vld [vmem:[%s505_s3 + $0x60] sm:$0xff] }
   0xb   :  { %325 = vmatpush3.bf16.msra.mxu1 %v322_v12  ;;  %v338_v25 = vpack.c.bf16 %v129_v24, %v128_v23  ;;  %v131_v27 = vld [vmem:[%s505_s3 + $0x68] sm:$0xff]  ;;  %v132_v29 = vld [vmem:[%s505_s3 + $0x70] sm:$0xff]  ;;  %v133_v30 = vld [vmem:[%s505_s3 + $0x78] sm:$0xff]  ;;  %s377_s3 = smov [#allocation2]  }
   0xc   :  { %273 = vmatmul.mubr.msk.f32.vlgmr.msra.gmra.mrb[0].mxu0 %vm34_vm0, %v22_v16  ;;  %327 = vmatprep.subr.bf16.mxu1 %v326_v15  ;;  %v342_v28 = vpack.c.bf16 %v131_v27, %v130_v26  ;;  %v346_v31 = vpack.c.bf16 %v133_v30, %v132_v29  ;;  %v236_v32 = vld [vmem:[%s504_s2] ss:$0 sm:$0xff]  ;;  %s225_s13 = sshll.u32 %s377_s3, 4  ;;  %s226_s13 = int_to_ptr.vmem [resolvable:$true] %s225_s13 }
   0xd   :  { %v239_v39 = vld [vmem:[%s506_s4] ss:$0 sm:$0xff]  ;;  %s353_s2 = scalar_lea.vmem %s226_s13, 256  ;;  %p358_p1 = scmp.lt.s32.totalorder %s226_s13, %s226_s13 }
   0xe   :  { %p354_p0 = scmp.ne.s32.totalorder %s226_s13, %s353_s2  ;;  %p359_p2 = scmp.lt.s32.totalorder %s353_s2, %s353_s2 }
   0xf   :  { %329 = vmatpush3.bf16.msra.mxu1 %v326_v15 }
  0x10   :  { %331 = vmatprep.subr.bf16.mxu1 %v330_v19  ;;  %p360_p3 = por %p359_p2, %p358_p1 }
  0x12   :  { %p361_p4 = pnand %p360_p3, %p354_p0 }
  0x13   :  { %333 = vmatpush3.bf16.msra.mxu1 %v330_v19 }
  0x14   :  { %335 = vmatprep.subr.bf16.mxu1 %v334_v22 }
  0x17   :  { %337 = vmatpush3.bf16.msra.mxu1 %v334_v22 }
  0x18   :  { %339 = vmatprep.subr.bf16.mxu1 %v338_v25 }
  0x1b   :  { %341 = vmatpush3.bf16.msra.mxu1 %v338_v25 }
  0x1c   :  { %343 = vmatprep.subr.bf16.mxu1 %v342_v28 }
  0x1f   :  { %345 = vmatpush3.bf16.msra.mxu1 %v342_v28 }
  0x20   :  { %347 = vmatprep.subr.bf16.mxu1 %v346_v31 }
  0x23   :  { %349 = vmatpush3.bf16.msra.mxu1 %v346_v31 }
  0xdf   :  { %v274_v33 = vpop.f32.mrb[0].mxu0 }
  0xe0   :  { %v113_v34 = vadd.f32 %v274_v33, %v236_v32  ;;  %v107_v35 = vpop.f32.mrb[1].mxu0 }
  0xe1   :  { %v108_v36 = vadd.f32 %v236_v32, %v107_v35 }
  0xe2   :  { %v117_v38 = vmax.f32 %v113_v34, 0.0 }
  0xe3   :  { %v116_v37 = vmax.f32 %v108_v36, 0.0 }
  0xe5   :  { %307 = vmatprep.mubr.f32.mxu1 %v116_v37 }
  0xe6   :  { %308 = vmatmul.mubr.f32.vlgmr.msra.gmra.mrb[0].mxu1 %v117_v38 }
 0x1b9   :  { %v309_v40 = vpop.f32.mrb[0].mxu1 }
 0x1ba   :  { %v213_v41 = vadd.f32 %v309_v40, %v239_v39  ;;  %v207_v42 = vpop.f32.mrb[1].mxu1 }
 0x1bb   :  { %v208_v43 = vadd.f32 %v239_v39, %v207_v42 }
 0x1bc   :  { %v217_v44 = vadd.f32 %v213_v41, %v22_v16 }
 0x1bd   :  { %v216_v45 = vadd.f32 %v208_v43, %v425_v5 }
 0x1be   :  { %219 = vst.msk [vmem:[#allocation2 + $0x8] sm:$0xff] %vm34_vm0, %v217_v44 }
 0x1bf   :  { %218 = vst.msk [vmem:[#allocation2] sm:$0xff] %vm34_vm0, %v216_v45 }
 0x1c0   :  { %364 = shalt.err (!%p361_p4)
}
 0x1c1   :  { %s365_s15 = scalar_lea.hbm %s507_s5, 256 }
 0x1c2   :  { %p366_p5 = scmp.ne.s32.totalorder %s507_s5, %s365_s15  ;;  %p369_p6 = scmp.lt.u32.totalorder %s365_s15, %s507_s5 }
 0x1c4   :  { %p371_p7 = pnand %p369_p6, %p366_p5 }
 0x1c6   :  { %374 = shalt.err (!%p371_p7)
}
 0x1c7   :  { %s378_s20 = smov 128   ;;  %s379_s21 = smov 8  }
 0x1c8   :  { %231 = dma.vmem_to_hbm [thread:$0]  %s226_s13, 256, %s507_s5, [#allocation3], %s378_s20, %s378_s20, %s379_s21  }
 0x1c9   :  { %375 = dma.done.wait [#allocation3], 256  }
 0x1ca   :  { %376 = vsyncadd [#allocation3], 4294967040 }
 0x1cb   :  { %235 = vsyncpa [#allocation3], 1 }

</bundles_post_ra>
